<compile_context>
chip_gen: v7x
topology: tpu7x:2x2x1
jax: 0.10.0
libtpu: 0.0.40
codegen_flags: <defaults>
</compile_context>

<pallas_src>
import jax
import jax.numpy as jnp
from jax import lax
from jax.experimental import pallas as pl
from jax.experimental.pallas import tpu as pltpu

_TARGET_BLOCK_BYTES = 4 * 1024 * 1024   # ~4 MiB per pipelined block
_VMEM_LIMIT_BYTES = 32 * 1024 * 1024    # raise v5e's 16 MiB scoped default


def abc_kernel(scale_ref, x_ref, o_ref):
    # scale_ref: (1,) f32 in SMEM holding 100 * (1/10)^n
    # x_ref / o_ref: (tr, lanes) tiles in VMEM in the native I/O dtype
    x = x_ref[...].astype(jnp.float32)
    o_ref[...] = ((x + 1.0) * scale_ref[0]).astype(o_ref.dtype)


def abc_forward(x, b_loop_count):
    orig_shape = x.shape
    orig_dtype = x.dtype
    total = x.size

    # Combined scale for B (n repeated /10) followed by C (*100); n may be a
    # traced scalar.  NOTE: collapsing n divides into one multiply is ~n ulps
    # away from bit-exact repeated division (fine at the asserted tolerance).
    n = jnp.asarray(b_loop_count, dtype=jnp.int32)
    inv = lax.fori_loop(0, n, lambda i, a: a / jnp.float32(10.0), jnp.float32(1.0))
    scale = jnp.reshape(inv * jnp.float32(100.0), (1,))

    # Native-dtype I/O for floating inputs (halves HBM traffic for 16-bit).
    if jnp.issubdtype(orig_dtype, jnp.floating):
        io_dtype = orig_dtype
    else:
        # TODO(synk): PyTorch promotes integer inputs to float here; we cast
        # back to the original integer dtype instead (behavior diverges).
        io_dtype = jnp.float32
    itemsize = jnp.dtype(io_dtype).itemsize
    sublane_mult = max(8, 32 // itemsize)   # 8 (f32) / 16 (bf16) / 32 (8-bit)

    flat = x.reshape(-1).astype(io_dtype)

    # Widest lane dim that divides the element count -> no whole-array pad
    # pass and denser vector stores.  Only pad for non-multiple-of-128 sizes.
    lanes = None
    for cand in (1024, 512, 256, 128):
        if total % cand == 0:
            lanes = cand
            break
    if lanes is None:
        lanes = 128
        padded_total = pl.cdiv(total, lanes) * lanes
        flat = jnp.pad(flat, (0, padded_total - total))
    else:
        padded_total = total

    rows = padded_total // lanes
    x2 = flat.reshape(rows, lanes)

    # Row tile: ~4 MiB blocks amortize the ~0.35 us/grid-step overhead; with
    # default double buffering (2 in + 2 out) VMEM use stays <= 16 MiB.
    tr_target = max(sublane_mult, _TARGET_BLOCK_BYTES // (lanes * itemsize))
    if rows <= tr_target:
        tr = rows                                   # block == full array dim
    else:
        tr = (tr_target // sublane_mult) * sublane_mult
    grid = (pl.cdiv(rows, tr),)   # ragged last block is masked by Pallas

    out = pl.pallas_call(
        abc_kernel,
        out_shape=jax.ShapeDtypeStruct((rows, lanes), io_dtype),
        grid=grid,
        in_specs=[
            pl.BlockSpec(memory_space=pltpu.MemorySpace.SMEM),   # scale scalar
            pl.BlockSpec((tr, lanes), lambda i: (i, 0)),         # x row block
        ],
        out_specs=pl.BlockSpec((tr, lanes), lambda i: (i, 0)),
        compiler_params=pltpu.CompilerParams(
            dimension_semantics=("parallel",),
            vmem_limit_bytes=_VMEM_LIMIT_BYTES),
    )(scale, x2)

    out_flat = out.reshape(-1)
    if padded_total != total:
        out_flat = out_flat[:total]
    return out_flat.reshape(orig_shape).astype(orig_dtype)


if __name__ == "__main__":
    key = jax.random.PRNGKey(0)
    b_loop_count = 3  # dynamic loop count argument to module B

    # --- f32 check (NCHW, small shape) ---
    x = jax.random.normal(key, (2, 4, 16, 16), dtype=jnp.float32)
    out = jax.block_until_ready(abc_forward(x, b_loop_count))

    ref = x + 1.0
    for _ in range(b_loop_count):
        ref = ref / 10.0
    ref = ref * 100.0

    assert out.shape == x.shape and out.dtype == x.dtype
    assert jnp.allclose(out, ref, rtol=1e-5, atol=1e-6), "f32 mismatch vs reference"

    # --- bf16 check (exercises the native-dtype I/O path) ---
    xb = jax.random.normal(key, (2, 4, 16, 16), dtype=jnp.bfloat16)
    outb = jax.block_until_ready(abc_forward(xb, b_loop_count))

    refb = xb.astype(jnp.float32) + 1.0
    for _ in range(b_loop_count):
        refb = refb / 10.0
    refb = (refb * 100.0).astype(jnp.bfloat16)

    assert outb.shape == xb.shape and outb.dtype == xb.dtype
    assert jnp.allclose(outb.astype(jnp.float32), refb.astype(jnp.float32),
                        rtol=2e-2, atol=1e-2), "bf16 mismatch vs reference"

    print("KERNEL_OK")
</pallas_src>

<mosaic_0001>
module attributes {stable_mosaic.version = 11 : i64} {
  func.func @abc_kernel(%arg0: i32, %arg1: memref<1xf32, #tpu.memory_space<smem>>, %arg2: memref<2x1024xf32, #tpu.memory_space<vmem>>, %arg3: memref<2x1024xf32, #tpu.memory_space<vmem>>) attributes {dimension_semantics = [#tpu.dimension_semantics<parallel>], iteration_bounds = array<i64: 1>, scalar_prefetch = 0 : i64, scratch_operands = 0 : i64, tpu.core_type = #tpu.core_type<tc>, window_params = [{transform_indices = @transform_0, window_bounds = array<i64: 1>}, {transform_indices = @transform_1, window_bounds = array<i64: 2, 1024>}, {transform_indices = @transform_2, window_bounds = array<i64: 2, 1024>}]} {
    %c0 = arith.constant 0 : index
    %c0_0 = arith.constant 0 : index
    %0 = vector.load %arg2[%c0, %c0_0] : memref<2x1024xf32, #tpu.memory_space<vmem>>, vector<2x1024xf32>
    %cst = arith.constant 1.000000e+00 : f32
    %1 = vector.broadcast %cst : f32 to vector<2x1024xf32>
    %2 = arith.addf %0, %1 : vector<2x1024xf32>
    %c0_1 = arith.constant 0 : index
    %3 = memref.load %arg1[%c0_1] : memref<1xf32, #tpu.memory_space<smem>>
    %4 = vector.broadcast %3 : f32 to vector<2x1024xf32>
    %5 = arith.mulf %2, %4 : vector<2x1024xf32>
    %c0_2 = arith.constant 0 : index
    %c0_3 = arith.constant 0 : index
    %6 = vector.load %arg3[%c0_2, %c0_3] : memref<2x1024xf32, #tpu.memory_space<vmem>>, vector<2x1024xf32>
    tpu.vector_store %arg3[%c0_2, %c0_3], %5 {strides = array<i32>} : memref<2x1024xf32, #tpu.memory_space<vmem>>, vector<2x1024xf32>,
    return
  }
  func.func @transform_0(%arg0: i32) -> i32 {
    %c0_i32 = arith.constant 0 : i32
    %c0_i32_0 = arith.constant 0 : i32
    return %c0_i32 : i32
  }
  func.func @transform_1(%arg0: i32) -> (i32, i32) {
    %c0_i32 = arith.constant 0 : i32
    %c0_i32_0 = arith.constant 0 : i32
    return %arg0, %c0_i32 : i32, i32
  }
  func.func @transform_2(%arg0: i32) -> (i32, i32) {
    %c0_i32 = arith.constant 0 : i32
    %c0_i32_0 = arith.constant 0 : i32
    return %arg0, %c0_i32 : i32, i32
  }
}

</mosaic_0001>

<bundles_post_ra>
// kernel: tpu_custom_call.1
= control target key start
LH: loop header
LB: loop body
LE: loop exit
PB: predicated region body
PF: predicated region fallthrough
CT: control target
= control target key end

     0   :  { %8 = vsyncpa [#allocation4], 0  ;;  %s144_s0 = inlined_call_operand.<no memory space> [shape: f32[1], index: 0, kind: input, shape index: {}]   ;;  %s145_s1 = inlined_call_operand.hbm [shape: f32[2,1024], index: 1, kind: input, shape index: {}]   ;;  %s146_s2 = inlined_call_operand.hbm [shape: f32[2,1024], index: 2, kind: output, shape index: {}]  }
   0x1   :  { %9 = vsyncpa [#allocation5], 0  ;;  %s100_s9 = smov [#allocation3]   ;;  %s52_s13 = scalar_lea.hbm %s145_s1, 256 }
   0x2   :  { %s18_s10 = sshll.u32 %s100_s9, 4  ;;  %p53_p0 = scmp.ne.s32.totalorder %s145_s1, %s52_s13  ;;  %s19_s10 = int_to_ptr.vmem [resolvable:$true] %s18_s10 }
   0x3   :  { %p56_p1 = scmp.lt.u32.totalorder %s52_s13, %s145_s1 }
   0x5   :  { %p58_p2 = pnand %p56_p1, %p53_p0 }
   0x7   :  { %61 = shalt.err (!%p58_p2)
}
   0x8   :  { %s62_s18 = scalar_lea.vmem %s19_s10, 256  ;;  %p67_p4 = scmp.lt.s32.totalorder %s19_s10, %s19_s10 }
   0x9   :  { %p63_p3 = scmp.ne.s32.totalorder %s19_s10, %s62_s18  ;;  %p68_p5 = scmp.lt.s32.totalorder %s62_s18, %s62_s18 }
   0xb   :  { %p69_p6 = por %p68_p5, %p67_p4 }
   0xd   :  { %p70_p7 = pnand %p69_p6, %p63_p3 }
   0xf   :  { %73 = shalt.err (!%p70_p7)
}
  0x10   :  { %21 = dma.hbm_to_vmem [thread:$0]  %s145_s1, 256, %s19_s10, [#allocation4]  }
  0x11   :  { %96 = dma.done.wait [#allocation4], 256  }
  0x12   :  { %97 = vsyncadd [#allocation4], 4294967040  ;;  %v25_v0 = vld [vmem:[#allocation3] sm:$0xff]  ;;  %v30_v1 = vstv %s144_s0  ;;  %v26_v2 = vld [vmem:[#allocation3 + $0x8] sm:$0xff]  ;;  %s101_s23 = smov [#allocation6]  }
  0x13   :  { %s41_s24 = sshll.u32 %s101_s23, 4  ;;  %v27_v3 = vadd.f32 1.0, %v25_v0  ;;  %v28_v4 = vadd.f32 1.0, %v26_v2  ;;  %s42_s24 = int_to_ptr.vmem [resolvable:$true] %s41_s24 }
  0x14   :  { %s74_s25 = scalar_lea.vmem %s42_s24, 256  ;;  %p79_p9 = scmp.lt.s32.totalorder %s42_s24, %s42_s24 }
  0x15   :  { %v31_v5 = vmul.f32 %v30_v1, %v27_v3  ;;  %v32_v6 = vmul.f32 %v30_v1, %v28_v4  ;;  %p75_p8 = scmp.ne.s32.totalorder %s42_s24, %s74_s25  ;;  %p80_p10 = scmp.lt.s32.totalorder %s74_s25, %s74_s25 }
  0x17   :  { %33 = vst [vmem:[#allocation6] sm:$0xff] %v31_v5  ;;  %34 = vst [vmem:[#allocation6 + $0x8] sm:$0xff] %v32_v6  ;;  %p81_p11 = por %p80_p10, %p79_p9 }
  0x19   :  { %p82_p12 = pnand %p81_p11, %p75_p8 }
  0x1b   :  { %85 = shalt.err (!%p82_p12)
}
  0x1c   :  { %s86_s0 = scalar_lea.hbm %s146_s2, 256 }
  0x1d   :  { %p87_p13 = scmp.ne.s32.totalorder %s146_s2, %s86_s0  ;;  %p90_p0 = scmp.lt.u32.totalorder %s86_s0, %s146_s2 }
  0x1f   :  { %p92_p1 = pnand %p90_p0, %p87_p13 }
  0x21   :  { %95 = shalt.err (!%p92_p1)
}
  0x22   :  { %44 = dma.vmem_to_hbm [thread:$0]  %s42_s24, 256, %s146_s2, [#allocation5]  }
  0x23   :  { %98 = dma.done.wait [#allocation5], 256  }
  0x24   :  { %99 = vsyncadd [#allocation5], 4294967040 }
  0x25   :  { %48 = vsyncpa [#allocation4], 1 }
  0x26   :  { %49 = vsyncpa [#allocation5], 1 }

</bundles_post_ra>
